<compile_context>
chip_gen: v5e
topology: v5e:2x2
jax: 0.10.0
libtpu: 0.0.40
codegen_flags: <defaults>
</compile_context>

<pallas_src>
import jax
import jax.numpy as jnp
from jax.experimental import pallas as pl
from jax.experimental.pallas import tpu as pltpu


def _round_up(x, m):
    return ((x + m - 1) // m) * m


def _choose_row_tile(m, h, p):
    """Row tile sized against a conservative VMEM budget (safe on v5e/v6e/v7x)."""
    if m <= 8:
        # Single block; block_shape == full array dim satisfies the (8,128) rule.
        return m
    # Per-row VMEM bytes: double-buffered f32 activations (8H) + double-buffered
    # bf16 output (4P) + in-kernel bf16 operand copy (2H) + f32 temporaries (~8P).
    per_row = 10 * h + 12 * p
    budget = 16 * 1024 * 1024          # conservative; fits v5e 16 MiB scoped default
    tm = (budget // per_row) // 8 * 8
    tm = max(8, min(2048, tm))
    # Keep >=2 grid steps so the "parallel" axis shards across v7x's two TCs.
    tm = min(tm, _round_up(pl.cdiv(m, 2), 8))
    return int(tm)


def _actor_head_kernel(x_ref, w_ref, b_ref, out_ref):
    """out = tanh(x @ w + b), lane-dense bf16 output slab.

    x_ref  : (TM, H)  f32 or bf16 activations
    w_ref  : (H, P)   bf16 fused [mu | log_std | zero-pad] weights
    b_ref  : (1, P)   f32 fused bias
    out_ref: (TM, P)  bf16
    """
    x = x_ref[...]
    if x.dtype != jnp.bfloat16:
        x = x.astype(jnp.bfloat16)     # native MXU rate; f32 matmul is emulated
    h = jnp.dot(x, w_ref[...], preferred_element_type=jnp.float32)
    h = h + b_ref[...]
    # tanh in f32 (v5e VPU/EUP have no bf16); exp/select live in the wrapper.
    out_ref[...] = jnp.tanh(h).astype(out_ref.dtype)


class Normal:
    """Minimal JAX analog of the PyTorch Normal wrapper (glue, not kernel)."""

    def __init__(self, mu, std):
        self.mu = mu
        self.std = std

    @property
    def mean(self):
        return self.mu

    def entropy(self):
        return 0.5 + 0.5 * jnp.log(2.0 * jnp.pi) + jnp.log(self.std)

    def log_likelihood(self, x):
        var = self.std ** 2
        log_prob = (-((x - self.mu) ** 2) / (2.0 * var)
                    - jnp.log(self.std) - 0.5 * jnp.log(2.0 * jnp.pi))
        return log_prob.sum(axis=2)

    def rsample(self, key):
        # The PyTorch reference draws a SINGLE scalar eps shared across all
        # elements (dist.Normal(0, 1).sample()); we match that behavior.
        eps = jax.random.normal(key, ())
        return self.mu + eps * self.std


class GaussianActorPallas:
    def __init__(self, hidden_size, act_dim, action_tanh, max_length,
                 log_std_bounds=(-5.0, 2.0), *, key):
        assert action_tanh, "kernel implements the action_tanh=True branch"
        self.hidden_size = hidden_size
        self.act_dim = act_dim
        self.max_length = max_length
        self.log_std_bounds = log_std_bounds

        # Folded rescale: min + 0.5*(max-min)*(t+1) == t*scale + shift
        self._ls_scale = 0.5 * (log_std_bounds[1] - log_std_bounds[0])
        self._ls_shift = log_std_bounds[0] + self._ls_scale

        # Deterministic init mimicking nn.Linear: U(-1/sqrt(H), 1/sqrt(H))
        k1, k2, k3, k4 = jax.random.split(key, 4)
        bound = 1.0 / jnp.sqrt(hidden_size)
        self.w_mu = jax.random.uniform(k1, (hidden_size, act_dim), jnp.float32,
                                       -bound, bound)
        self.b_mu = jax.random.uniform(k2, (act_dim,), jnp.float32, -bound, bound)
        self.w_std = jax.random.uniform(k3, (hidden_size, act_dim), jnp.float32,
                                        -bound, bound)
        self.b_std = jax.random.uniform(k4, (act_dim,), jnp.float32, -bound, bound)

        # Fused, lane-padded parameters: (H, P) bf16 and (1, P) f32,
        # P = round_up(2A, 128).  Do NOT widen P beyond that (kernel is HBM
        # bound, not MXU bound).
        self._p = _round_up(2 * act_dim, 128)
        pad = self._p - 2 * act_dim
        w_cat = jnp.concatenate([self.w_mu, self.w_std], axis=1)          # (H, 2A)
        b_cat = jnp.concatenate([self.b_mu, self.b_std], axis=0)[None]    # (1, 2A)
        self._w_fused = jnp.pad(w_cat, ((0, 0), (0, pad))).astype(jnp.bfloat16)
        self._b_fused = jnp.pad(b_cat, ((0, 0), (0, pad))).astype(jnp.float32)

    def __call__(self, obs):
        # obs: (B, T, H) float32
        B, T, H = obs.shape
        L = min(self.max_length, T)
        A = self.act_dim
        P = self._p
        M = B * L

        if L < T:
            # The linear heads are per-timestep, so slicing before the matmul is
            # equivalent to the reference's matmul-then-slice.  The single
            # unavoidable slice copy is fused with a bf16 cast so the kernel
            # reads half the bytes.
            # TODO(synk): fold the (T - L) offset into the index_map (needs
            # element-offset block indexing) to remove this copy entirely.
            x2d = obs[:, T - L:, :].astype(jnp.bfloat16).reshape(M, H)
        else:
            # Contiguous reshape is free; obs is read from HBM exactly once
            # (f32), cast to bf16 inside the kernel.
            x2d = obs.reshape(M, H)

        TM = _choose_row_tile(M, H, P)
        grid = (pl.cdiv(M, TM),)     # partial trailing block; no jnp.pad round trip

        cost = pl.CostEstimate(
            flops=2 * M * H * P,
            transcendentals=M * P,   # tanh only
            bytes_accessed=int(x2d.dtype.itemsize * M * H
                               + 2 * H * P + 4 * P + 2 * M * P),
        )

        out = pl.pallas_call(
            _actor_head_kernel,
            out_shape=jax.ShapeDtypeStruct((M, P), jnp.bfloat16),
            grid=grid,
            in_specs=[
                pl.BlockSpec((TM, H), lambda i: (i, 0)),               # activations
                pl.BlockSpec((H, P), lambda i: (0, 0),
                             pipeline_mode=pl.Buffered(1)),            # fused weights
                pl.BlockSpec((1, P), lambda i: (0, 0),
                             pipeline_mode=pl.Buffered(1)),            # fused bias
            ],
            out_specs=pl.BlockSpec((TM, P), lambda i: (i, 0)),
            compiler_params=pltpu.CompilerParams(
                dimension_semantics=("parallel",),
                vmem_limit_bytes=32 * 1024 * 1024,
            ),
            cost_estimate=cost,
        )(x2d, self._w_fused, self._b_fused)

        # Wrapper glue: slice useful columns, rescale + exp only on (M, A).
        mu = out[:, :A].astype(jnp.float32).reshape(B, L, A)
        t_std = out[:, A:2 * A].astype(jnp.float32).reshape(B, L, A)
        std = jnp.exp(t_std * self._ls_scale + self._ls_shift)
        return Normal(mu, std)


def _reference(obs, actor):
    """Pure-JAX f32 reference of the PyTorch forward."""
    T = obs.shape[1]
    L = min(actor.max_length, T)
    x = obs[:, T - L:, :]
    mu = jnp.tanh(x @ actor.w_mu + actor.b_mu)
    t = jnp.tanh(x @ actor.w_std + actor.b_std)
    lo, hi = actor.log_std_bounds
    ls = lo + 0.5 * (hi - lo) * (t + 1.0)
    return mu, jnp.exp(ls)


def _check(actor, obs, B, L, A):
    out = actor(obs)
    jax.block_until_ready(out.mu)
    jax.block_until_ready(out.std)
    mu_ref, std_ref = _reference(obs, actor)
    assert out.mu.shape == (B, L, A)
    assert out.std.shape == (B, L, A)
    # bf16 matmul operands + bf16 output slab -> loosened tolerances vs f32 ref.
    assert jnp.allclose(out.mu, mu_ref, atol=3e-2, rtol=3e-2)
    assert jnp.allclose(out.std, std_ref, atol=2e-2, rtol=8e-2)


if __name__ == "__main__":
    key = jax.random.PRNGKey(0)
    k_param, k_obs1, k_obs2 = jax.random.split(key, 3)

    B, T, hidden_size, act_dim, max_length = 2, 8, 32, 6, 4

    actor = GaussianActorPallas(hidden_size, act_dim, action_tanh=True,
                                max_length=max_length,
                                log_std_bounds=(-5.0, 2.0),
                                key=k_param)

    # Case 1: T > max_length (sliced, bf16-cast activation path).
    obs1 = jax.random.normal(k_obs1, (B, T, hidden_size), dtype=jnp.float32)
    _check(actor, obs1, B, max_length, act_dim)

    # Case 2: T == max_length (no-copy reshape path, partial trailing row block,
    # 2-step "parallel" grid).
    obs2 = jax.random.normal(k_obs2, (3, max_length, hidden_size),
                             dtype=jnp.float32)
    _check(actor, obs2, 3, max_length, act_dim)

    print("KERNEL_OK")
</pallas_src>

<mosaic_0001>
module attributes {stable_mosaic.version = 11 : i64} {
  func.func @_actor_head_kernel(%arg0: i32, %arg1: memref<8x32xbf16, #tpu.memory_space<vmem>>, %arg2: memref<32x128xbf16, #tpu.memory_space<vmem>>, %arg3: memref<1x128xf32, #tpu.memory_space<vmem>>, %arg4: memref<8x128xbf16, #tpu.memory_space<vmem>>) attributes {dimension_semantics = [#tpu.dimension_semantics<parallel>], iteration_bounds = array<i64: 1>, scalar_prefetch = 0 : i64, scratch_operands = 0 : i64, tpu.core_type = #tpu.core_type<tc>, window_params = [{transform_indices = @transform_0, window_bounds = array<i64: 8, 32>}, {pipeline_mode = #tpu.pipeline_mode<synchronous>, transform_indices = @transform_1, window_bounds = array<i64: 32, 128>}, {pipeline_mode = #tpu.pipeline_mode<synchronous>, transform_indices = @transform_2, window_bounds = array<i64: 1, 128>}, {transform_indices = @transform_3, window_bounds = array<i64: 8, 128>}]} {
    %c0 = arith.constant 0 : index
    %c0_0 = arith.constant 0 : index
    %0 = vector.load %arg1[%c0, %c0_0] : memref<8x32xbf16, #tpu.memory_space<vmem>>, vector<8x32xbf16>
    %c0_1 = arith.constant 0 : index
    %c0_2 = arith.constant 0 : index
    %1 = vector.load %arg2[%c0_1, %c0_2] : memref<32x128xbf16, #tpu.memory_space<vmem>>, vector<32x128xbf16>
    %cst = arith.constant dense<0.000000e+00> : vector<8x128xf32>
    %2 = tpu.matmul %0, %1, %cst {dimension_numbers = #tpu.dot_dimension_numbers<[1], [0], [0], [1], [0, 0, 1, 1], [], []>} : vector<8x32xbf16>, vector<32x128xbf16>, vector<8x128xf32> -> vector<8x128xf32>
    %c0_3 = arith.constant 0 : index
    %c0_4 = arith.constant 0 : index
    %3 = vector.load %arg3[%c0_3, %c0_4] : memref<1x128xf32, #tpu.memory_space<vmem>>, vector<1x128xf32>
    %4 = vector.broadcast %3 : vector<1x128xf32> to vector<8x128xf32>
    %5 = arith.addf %2, %4 : vector<8x128xf32>
    %6 = math.tanh %5 : vector<8x128xf32>
    %7 = arith.truncf %6 : vector<8x128xf32> to vector<8x128xbf16>
    %c0_5 = arith.constant 0 : index
    %c0_6 = arith.constant 0 : index
    %8 = vector.load %arg4[%c0_5, %c0_6] : memref<8x128xbf16, #tpu.memory_space<vmem>>, vector<8x128xbf16>
    tpu.vector_store %arg4[%c0_5, %c0_6], %7 {strides = array<i32>} : memref<8x128xbf16, #tpu.memory_space<vmem>>, vector<8x128xbf16>,
    return
  }
  func.func @transform_0(%arg0: i32) -> (i32, i32) {
    %c0_i32 = arith.constant 0 : i32
    %c0_i32_0 = arith.constant 0 : i32
    return %arg0, %c0_i32 : i32, i32
  }
  func.func @transform_1(%arg0: i32) -> (i32, i32) {
    %c0_i32 = arith.constant 0 : i32
    %c0_i32_0 = arith.constant 0 : i32
    %c0_i32_1 = arith.constant 0 : i32
    return %c0_i32, %c0_i32_0 : i32, i32
  }
  func.func @transform_2(%arg0: i32) -> (i32, i32) {
    %c0_i32 = arith.constant 0 : i32
    %c0_i32_0 = arith.constant 0 : i32
    %c0_i32_1 = arith.constant 0 : i32
    return %c0_i32, %c0_i32_0 : i32, i32
  }
  func.func @transform_3(%arg0: i32) -> (i32, i32) {
    %c0_i32 = arith.constant 0 : i32
    %c0_i32_0 = arith.constant 0 : i32
    return %arg0, %c0_i32 : i32, i32
  }
}

</mosaic_0001>

<bundles_post_ra>
// kernel: tpu_custom_call.1
= control target key start
LH: loop header
LB: loop body
LE: loop exit
PB: predicated region body
PF: predicated region fallthrough
CT: control target
= control target key end

     0   :  { %8 = vsyncpa [#allocation3], 0  ;;  %s239_s0 = inlined_call_operand.hbm [shape: bf16[8,32], index: 0, kind: input, shape index: {}]   ;;  %s240_s1 = inlined_call_operand.hbm [shape: bf16[32,128], index: 1, kind: input, shape index: {}]   ;;  %s241_s2 = inlined_call_operand.vmem [shape: f32[1,128], index: 2, kind: input, shape index: {}]   ;;  %s242_s3 = inlined_call_operand.hbm [shape: bf16[8,128], index: 3, kind: output, shape index: {}]  }
   0x1   :  { %9 = vsyncpa [#allocation6], 0 }
   0x2   :  { %10 = vsyncpa [#allocation4], 0  ;;  %s16_s14 = sshll.u32 %s239_s0, 4  ;;  %s202_s15 = smov [#allocation2]   ;;  %s17_s14 = int_to_ptr.hbm [resolvable:$true] %s16_s14 }
   0x3   :  { %s18_s16 = sshll.u32 %s202_s15, 4  ;;  %s26_s19 = sshll.u32 %s240_s1, 4  ;;  %s19_s16 = int_to_ptr.vmem [resolvable:$true] %s18_s16  ;;  %s27_s19 = int_to_ptr.hbm [resolvable:$true] %s26_s19 }
   0x4   :  { %21 = dma.hbm_to_vmem [thread:$0]  %s17_s14, 64, %s19_s16, [#allocation3]  }
   0x5   :  { %s203_s20 = smov [#allocation5]   ;;  %s204_s22 = smov 64  }
   0x6   :  { %s28_s21 = sshll.u32 %s203_s20, 4  ;;  %s205_s23 = smov 4   ;;  %s29_s21 = int_to_ptr.vmem [resolvable:$true] %s28_s21 }
   0x7   :  { %34 = dma.hbm_to_vmem [thread:$0]  %s27_s19, 256, %s29_s21, [#allocation6], %s204_s22, %s204_s22, %s205_s23  }
   0x8   :  { %196 = dma.done.wait [#allocation3], 64  }
   0x9   :  { %197 = vsyncadd [#allocation3], 4294967232 }
   0xa   :  { %198 = dma.done.wait [#allocation6], 256  }
   0xb   :  { %199 = vsyncadd [#allocation6], 4294967040  ;;  %v115_v0 = vld [vmem:[#allocation5 + $0x8] sm:$0xff]  ;;  %v114_v1 = vld [vmem:[#allocation5] sm:$0xff]  ;;  %vm67_vm0 = vcmask 261120   ;;  %s206_s24 = smov [#allocation7]  }
   0xc   :  { %77 = vmatpush.bf16.msra.mxu0 %v115_v0  ;;  %v46_v2 = vld [vmem:[#allocation2] sm:$0xf]  ;;  %s92_s25 = sshll.u32 %s206_s24, 4  ;;  %s94_s28 = sshll.u32 %s242_s3, 4  ;;  %s93_s25 = int_to_ptr.vmem [resolvable:$true] %s92_s25  ;;  %s95_s28 = int_to_ptr.hbm [resolvable:$true] %s94_s28 }
   0xd   :  { %v121_v3 = vld [vmem:[%s241_s2] ss:$0 sm:$0xff] }
  0x10   :  { %78 = vmatpush.bf16.msra.mxu0 %v114_v1 }
  0x13   :  { %113 = vmatmul.msk.bf16.vlgmr.msra.gmra.mxu0 %vm67_vm0, %v46_v2 }
  0x90   :  { %v80_v4 = vpop.f32.mrf.mxu0 }
  0x91   :  { %v81_v5 = vadd.f32 %v121_v3, %v80_v4 }
  0x93   :  { %122 = vtanh.f32 %v81_v5 }
  0x98   :  { %v82_v6 = vpop.f32.mrf.mxu0 }
  0x99   :  { %v123_v7 = vpop.eup %122 }
  0x9a   :  { %v85_v8 = vpack.c.bf16 %v123_v7, %v123_v7 }
  0x9c   :  { %86 = vst [vmem:[#allocation7] sm:$0xf] %v85_v8 }
  0x9d   :  { %97 = dma.vmem_to_hbm [thread:$0]  %s93_s25, 64, %s95_s28, [#allocation4]  }
  0x9e   :  { %200 = dma.done.wait [#allocation4], 64  }
  0x9f   :  { %201 = vsyncadd [#allocation4], 4294967232 }
  0xa0   :  { %102 = vsyncpa [#allocation3], 1 }
  0xa1   :  { %103 = vsyncpa [#allocation6], 1 }
  0xa2   :  { %104 = vsyncpa [#allocation4], 1 }

</bundles_post_ra>
